<compile_context>
chip_gen: v7x
topology: tpu7x:2x2x1
jax: 0.10.0
libtpu: 0.0.40
codegen_flags: <defaults>
</compile_context>

<pallas_src>
import jax
import jax.numpy as jnp
from jax.experimental import pallas as pl
from jax.experimental.pallas import tpu as pltpu


def _dfl_kernel(x_ref, o_ref):
    # x_ref: (R, c1, TA) block of logits; o_ref: (R, TA) expectations.
    x = x_ref[...].astype(jnp.float32)                       # (R, c1, TA)
    R, c1, _ = x.shape

    # Numerically-stable softmax pieces over the c1 (sublane) axis.
    m = jnp.max(x, axis=1, keepdims=True)                    # (R, 1, TA)
    e = jnp.exp(x - m)                                        # (R, c1, TA)

    # Fold both bin reductions into one batched MXU contraction:
    #   wb[r, 0, c] = c    (bin value  -> expectation numerator)
    #   wb[r, 1, c] = 1    (           -> softmax denominator)
    #   wb[r, 2:,c] = 0    (pad rows so M=8 is sublane-aligned)
    k_idx = jax.lax.broadcasted_iota(jnp.int32, (R, 8, c1), 1)
    c_idx = jax.lax.broadcasted_iota(jnp.int32, (R, 8, c1), 2)
    wb = jnp.where(k_idx == 0, c_idx.astype(jnp.float32),
                   jnp.where(k_idx == 1, 1.0, 0.0))           # (R, 8, c1)

    res = jnp.einsum("rkc,rct->rkt", wb, e,
                     preferred_element_type=jnp.float32)      # (R, 8, TA)
    num = res[:, 0, :]                                        # sum_c c * e_c
    den = res[:, 1, :]                                        # sum_c e_c

    # Exact divide: one per 16 inputs, not a bottleneck.
    o_ref[...] = (num / den).astype(o_ref.dtype)


def _fit_tile(dim, want, align):
    """Largest multiple of `align` <= min(dim, want); or `dim` itself if
    dim < align (a full-extent block is always legal)."""
    if dim < align:
        return dim
    want = max(align, (want // align) * align)
    return min(want, (dim // align) * align)


def dfl_forward(x, c1=16, *, block_rows=32, block_anchors=2048):
    """x: (b, 4*c1, a) float  ->  (b, 4, a) in x.dtype."""
    b, c, a = x.shape
    assert c == 4 * c1, f"channel dim {c} must equal 4*c1={4 * c1}"

    n = b * 4
    xk = x.reshape(n, c1, a)            # free reshape, no data movement

    R = _fit_tile(n, block_rows, 8)
    TA = _fit_tile(a, block_anchors, 128)

    # Small-shape adaptivity: ensure >=2 blocks along at least one parallel
    # axis so v7x's two TensorCores both get work and the input DMA pipeline
    # has something to overlap with.
    if pl.cdiv(n, R) * pl.cdiv(a, TA) < 2:
        if a >= 2 * 128:
            TA = ((a // 2) // 128) * 128
        elif n >= 2 * 8:
            R = ((n // 2) // 8) * 8

    grid = (pl.cdiv(n, R), pl.cdiv(a, TA))

    out = pl.pallas_call(
        _dfl_kernel,
        out_shape=jax.ShapeDtypeStruct((n, a), x.dtype),
        grid_spec=pltpu.PrefetchScalarGridSpec(
            num_scalar_prefetch=0,
            grid=grid,
            in_specs=[pl.BlockSpec((R, c1, TA), lambda i, j: (i, 0, j))],
            out_specs=pl.BlockSpec((R, TA), lambda i, j: (i, j)),
        ),
        compiler_params=pltpu.CompilerParams(
            dimension_semantics=("parallel", "parallel"),
            vmem_limit_bytes=32 * 1024 * 1024,
        ),
    )(xk)

    return out.reshape(b, 4, a)


def _dfl_reference(x, c1=16):
    b, c, a = x.shape
    xv = x.reshape(b, 4, c1, a).astype(jnp.float32)
    p = jax.nn.softmax(xv, axis=2)
    w = jnp.arange(c1, dtype=jnp.float32).reshape(1, 1, c1, 1)
    return jnp.sum(p * w, axis=2).astype(x.dtype)             # (b, 4, a)


if __name__ == "__main__":
    c1 = 16
    b, a = 2, 300  # small; a not a multiple of 128 exercises the edge-block path
    key = jax.random.PRNGKey(0)
    x = jax.random.normal(key, (b, 4 * c1, a), dtype=jnp.float32)

    out = jax.block_until_ready(dfl_forward(x, c1=c1))
    ref = _dfl_reference(x, c1=c1)

    assert out.shape == (b, 4, a)
    assert out.dtype == x.dtype
    # Tolerance leaves headroom for MXU rounding of the f32 contraction on
    # chips where the compiler lowers it through bf16 passes; expectations
    # range over [0, c1-1].
    err = float(jnp.max(jnp.abs(out.astype(jnp.float32) - ref.astype(jnp.float32))))
    assert jnp.allclose(out, ref, atol=2e-2, rtol=2e-3), err

    print("KERNEL_OK")
</pallas_src>

<mosaic_0001>
module attributes {stable_mosaic.version = 11 : i64} {
  func.func @_dfl_kernel(%arg0: i32, %arg1: i32, %arg2: memref<8x16x256xf32, #tpu.memory_space<vmem>>, %arg3: memref<8x256xf32, #tpu.memory_space<vmem>>) attributes {dimension_semantics = [#tpu.dimension_semantics<parallel>, #tpu.dimension_semantics<parallel>], iteration_bounds = array<i64: 1, 2>, scalar_prefetch = 0 : i64, scratch_operands = 0 : i64, tpu.core_type = #tpu.core_type<tc>, window_params = [{transform_indices = @transform_0, window_bounds = array<i64: 8, 16, 256>}, {transform_indices = @transform_1, window_bounds = array<i64: 8, 256>}]} {
    %c0 = arith.constant 0 : index
    %c0_0 = arith.constant 0 : index
    %c0_1 = arith.constant 0 : index
    %0 = vector.load %arg2[%c0, %c0_0, %c0_1] : memref<8x16x256xf32, #tpu.memory_space<vmem>>, vector<8x16x256xf32>
    %cst = arith.constant dense<0xFF800000> : vector<8x256xf32>
    %1 = vector.multi_reduction <maximumf>, %0, %cst [1] : vector<8x16x256xf32> to vector<8x256xf32>
    %2 = vector.shape_cast %1 : vector<8x256xf32> to vector<8x1x256xf32>
    %3 = vector.broadcast %2 : vector<8x1x256xf32> to vector<8x16x256xf32>
    %4 = arith.subf %0, %3 : vector<8x16x256xf32>
    %5 = math.exp %4 : vector<8x16x256xf32>
    %6 = tpu.iota {dimensions = array<i32: 1>} : vector<8x8x16xi32>
    %7 = tpu.iota {dimensions = array<i32: 2>} : vector<8x8x16xi32>
    %c0_i32 = arith.constant 0 : i32
    %8 = vector.broadcast %c0_i32 : i32 to vector<8x8x16xi32>
    %9 = arith.cmpi eq, %6, %8 : vector<8x8x16xi32>
    %10 = arith.sitofp %7 : vector<8x8x16xi32> to vector<8x8x16xf32>
    %c1_i32 = arith.constant 1 : i32
    %11 = vector.broadcast %c1_i32 : i32 to vector<8x8x16xi32>
    %12 = arith.cmpi eq, %6, %11 : vector<8x8x16xi32>
    %cst_2 = arith.constant 1.000000e+00 : f32
    %cst_3 = arith.constant 0.000000e+00 : f32
    %13 = vector.broadcast %cst_2 : f32 to vector<8x8x16xf32>
    %14 = vector.broadcast %cst_3 : f32 to vector<8x8x16xf32>
    %15 = arith.select %12, %13, %14 : vector<8x8x16xi1>, vector<8x8x16xf32>
    %16 = arith.select %9, %10, %15 : vector<8x8x16xi1>, vector<8x8x16xf32>
    "tpu.trace_start"() <{level = 10 : i32, message = "rkc,rct->rkt"}> : () -> ()
    %cst_4 = arith.constant dense<0.000000e+00> : vector<8x8x256xf32>
    %17 = tpu.matmul %16, %5, %cst_4 {dimension_numbers = #tpu.dot_dimension_numbers<[2], [1], [1], [2], [0, 0, 0, 1, 1, 2], [0], [0]>} : vector<8x8x16xf32>, vector<8x16x256xf32>, vector<8x8x256xf32> -> vector<8x8x256xf32>
    "tpu.trace_stop"() : () -> ()
    %18 = vector.extract_strided_slice %17 {offsets = [0, 0, 0], sizes = [8, 1, 256], strides = [1, 1, 1]} : vector<8x8x256xf32> to vector<8x1x256xf32>
    %19 = vector.shape_cast %18 : vector<8x1x256xf32> to vector<8x256xf32>
    %20 = vector.extract_strided_slice %17 {offsets = [0, 1, 0], sizes = [8, 1, 256], strides = [1, 1, 1]} : vector<8x8x256xf32> to vector<8x1x256xf32>
    %21 = vector.shape_cast %20 : vector<8x1x256xf32> to vector<8x256xf32>
    %22 = arith.divf %19, %21 : vector<8x256xf32>
    %c0_5 = arith.constant 0 : index
    %c0_6 = arith.constant 0 : index
    %23 = vector.load %arg3[%c0_5, %c0_6] : memref<8x256xf32, #tpu.memory_space<vmem>>, vector<8x256xf32>
    tpu.vector_store %arg3[%c0_5, %c0_6], %22 {strides = array<i32>} : memref<8x256xf32, #tpu.memory_space<vmem>>, vector<8x256xf32>,
    return
  }
  func.func @transform_0(%arg0: i32, %arg1: i32) -> (i32, i32, i32) {
    %c0_i32 = arith.constant 0 : i32
    %c0_i32_0 = arith.constant 0 : i32
    return %arg0, %c0_i32, %arg1 : i32, i32, i32
  }
  func.func @transform_1(%arg0: i32, %arg1: i32) -> (i32, i32) {
    %c0_i32 = arith.constant 0 : i32
    return %arg0, %arg1 : i32, i32
  }
}

</mosaic_0001>

<bundles_post_ra>
// kernel: tpu_custom_call.1
= control target key start
LH: loop header
LB: loop body
LE: loop exit
PB: predicated region body
PF: predicated region fallthrough
CT: control target
= control target key end

     0   :  { %6 = vsyncpa [#allocation3], 0  ;;  %s1962_s0 = inlined_call_operand.hbm [shape: f32[8,16,300], index: 0, kind: input, shape index: {}]   ;;  %s1963_s1 = inlined_call_operand.hbm [shape: f32[8,300], index: 1, kind: output, shape index: {}]  }
   0x1   :  { %8 = vsyncpa [#allocation3 + $0x1], 0 }
   0x2   :  { %9 = vsyncpa [#allocation4], 0 }
   0x3   :  { %11 = vsyncpa [#allocation4 + $0x1], 0  ;;  %s1584_s6 = smov 0   ;;  %s1586_s7 = smov 0  }
   0x4   :  { %s1588_s8 = smov 0   ;;  %s1590_s9 = smov 0  }
   0x5   :  { %s1592_s10 = smov 0   ;;  %s1594_s11 = smov 0  }
   0x6 LB: > { %s1235_s12 = sadd.s32 4294967295, %s1567_s11   ;;  %s1236_s13 = sadd.s32 4294967294, %s1567_s11   ;;  %s1567_s11 = sphi %s1594_s11, %s17_s11   ;;  %s1563_s10 = sphi %s1592_s10, %s1974_s10   ;;  %s1559_s9 = sphi %s1590_s9, %s1973_s9   ;;  %s1555_s8 = sphi %s1588_s8, %s1972_s8   ;;  %s1551_s7 = sphi %s1586_s7, %s1971_s7   ;;  %s1547_s6 = sphi %s1584_s6, %s1970_s6  }
   0x7   : > { %s26_s14 = sadd.s32 1, %s1563_s10  ;;  %s38_s15 = sadd.s32 1, %s1555_s8 }
   0x8   : > { %p27_p0 = scmp.ge.s32.totalorder %s26_s14, 2  ;;  %p45_p1 = scmp.ne.s32.totalorder %s1555_s8, %s1551_s7 }
   0x9   : > { %p46_p2 = scmp.eq.s32.totalorder %s1567_s11, 0  ;;  %p51_p3 = scmp.ne.s32.totalorder %s1551_s7, %s1547_s6 }
   0xa   : > { %s1976_s14 = smov (%p27_p0, %s26_s14), 0  ;;  %p52_p5 = scmp.eq.s32.totalorder %s1235_s12, 0 }
   0xb   : > { %p47_p4 = por %p46_p2, %p45_p1  ;;  %s34_s16 = ssub.s32 %s1563_s10, %s1976_s14 }
   0xc   : > { %p77_p6 = scmp.eq.s32.totalorder %s1235_s12, 1  ;;  %p36_p7 = scmp.eq.s32.totalorder %s34_s16, 0 }
   0xd   : > { %p1627_p8 = por %p52_p5, %p51_p3  ;;  %p83_p10 = scmp.eq.s32.totalorder %s1236_s13, 1 }
   0xe   : > { %p1631_p9 = por %p77_p6, %p45_p1  ;;  %p1964_p12 = scmp.ge.s32.totalorder %s1567_s11, 2 }
   0xf   : > { %s1636_s19 = scalar_select %p36_p7, %s1555_s8, %s38_s15  }
  0x10   : > { %p1638_p11 = por %p83_p10, %p51_p3  ;;  %99 = sbr.rel (%p1964_p12) target bundleno = 58 (0x3a), region = 16 }
  0x12   : > { %s1967_s20 = scalar_select %p1638_p11, 1, 0 }
  0x17   : > { %102 = sbr.rel (!%p47_p4) target bundleno = 58 (0x3a), region = 20  ;;  %s103_s21 = sand.u32 (%p47_p4), 1, %s1555_s8  }
  0x18   : > { %s1240_s22 = sshll.u32 (%p47_p4), %s1563_s10, 1  ;;  %s1239_s23 = sshll.u32 (%p47_p4), %s103_s21, 8 }
  0x19   : > { %s110_s24 = ssub.s32 (%p47_p4), 3, %s1240_s22  ;;  %s1653_s27 = scalar_lea.sflag (%p47_p4), [#allocation3], %s103_s21 }
  0x1a   : > { %p111_p13 = scmp.lt.s32.totalorder (%p47_p4), %s110_s24, 2  ;;  %s107_s28 = scalar_lea.vmem (%p47_p4), [#allocation2], %s1239_s23 }
  0x1e   : > { %s1978_s24 = smov (!%p111_p13, %s110_s24), 2 }
  0x1f   : > { %s1650_s25 = sshll.u32 %s1978_s24, 11 }
  0x20   : > { %s115_s26 = ssub.s32 4096, %s1650_s25 }
  0x21   : > { %116 = vsyncadd %s1653_s27, %s115_s26  ;;  %p1242_p0 = scmp.ne.s32.totalorder %s1650_s25, 0  ;;  %s1267_s29 = sshll.u32 %s1563_s10, 8 }
  0x22   : > { %s1661_s3 = scalar_lea.hbm %s1962_s0, %s1267_s29  ;;  %s1244_s4 = sshll.u32 %s1978_s24, 3 }
  0x23   : > { %s124_s5 = sshll.u32 %s107_s28, 4  ;;  %s1457_s12 = scalar_lea.hbm %s1661_s3, %s1650_s25  ;;  %s1664_s5 = int_to_ptr.vmem [resolvable:$true] %s124_s5 }
  0x24   : > { %p1458_p1 = scmp.ne.s32.totalorder %s1661_s3, %s1457_s12  ;;  %s1461_s16 = scalar_lea.hbm %s1962_s0, 6144 }
  0x25   : > { %p1462_p4 = scmp.lt.u32.totalorder %s1661_s3, %s1962_s0  ;;  %p1463_p5 = scmp.lt.u32.totalorder %s1461_s16, %s1457_s12 }
  0x26   : > { %p1459_p2 = pnand %p1458_p1, %p1242_p0  ;;  %p1465_p7 = scmp.lt.u32.totalorder %s1457_s12, %s1661_s3 }
  0x27   : > { %p1464_p6 = por %p1463_p5, %p1462_p4 }
  0x28   : > { %p1460_p3 = pneg %p1459_p2 }
  0x29   : > { %p1466_p10 = por %p1465_p7, %p1464_p6 }
  0x2b   : > { %p1467_p13 = pnand %p1466_p10, %p1460_p3 }
  0x2d   : > { %1470 = shalt.err (!%p1467_p13)
}
  0x2e   : > { %s1471_s23 = scalar_lea.vmem %s1664_s5, %s1650_s25  ;;  %s1569_s26 = smov [#allocation2]  }
  0x2f   : > { %p1472_p1 = scmp.ne.s32.totalorder %s1664_s5, %s1471_s23  ;;  %s1475_s28 = sshll.u32 %s1569_s26, 4  ;;  %s1476_s28 = int_to_ptr.vmem [resolvable:$false] %s1475_s28 }
  0x30   : > { %s1477_s29 = scalar_lea.vmem %s1476_s28, 8192  ;;  %p1478_p11 = scmp.lt.s32.totalorder %s1664_s5, %s1476_s28 }
  0x31   : > { %p1473_p2 = pnand %p1472_p1, %p1242_p0  ;;  %p1479_p4 = scmp.lt.s32.totalorder %s1477_s29, %s1471_s23 }
  0x33   : > { %p1474_p12 = pneg %p1473_p2  ;;  %p1480_p5 = por %p1479_p4, %p1478_p11 }
  0x35   : > { %p1481_p6 = pnand %p1480_p5, %p1474_p12 }
  0x37   : > { %1484 = shalt.err (!%p1481_p6)
}
  0x38   : > { %s1570_s30 = smov 384   ;;  %s1571_s2 = smov 256  }
  0x39   : > { %130 = dma.hbm_to_vmem [thread:$0]  (%p1242_p0), %s1661_s3, %s1650_s25, %s1664_s5, %s1653_s27, %s1570_s30, %s1571_s2, %s1244_s4  }
  0x3a PF: > { %p1247_p3 = scmp.ge.s32.totalorder %s1567_s11, 1  ;;  %p132_p7 = scmp.lt.s32.totalorder %s1567_s11, 3 }
  0x3c   : > { %p133_p11 = pnand %p1247_p3, %p132_p7 }
  0x3d   : > { %s1696_s12 = sand.u32 (!%p133_p11), 1, %s1551_s7  }
  0x3e   : > { %136 = sbr.rel (%p133_p11) target bundleno = 412 (0x19c), region = 24  ;;  %s1248_s13 = sshll.u32 (!%p133_p11), %s1696_s12, 8 }
  0x3f   : > { %s139_s15 = scalar_lea.sflag (!%p133_p11), [#allocation3], %s1696_s12  ;;  %s1700_s16 = scalar_lea.vmem (!%p133_p11), [#allocation2], %s1248_s13 }
  0x45   : > { %1538 = dma.done.wait (%p1627_p8), %s139_s15, 4096  }
  0x46   : > { %1540 = vsyncadd (%p1627_p8), %s139_s15, 4294963200  ;;  %v412_v0 = vlaneseq  ;;  %v1572_v1 = vmov 0.0   ;;  %v1709_v4 = vld [vmem:[%s1700_s16 + $0x8] sm:$0xff]  ;;  %v1712_v5 = vld [vmem:[%s1700_s16 + $0x18] sm:$0xff]  ;;  %vm421_vm2 = vcmask 130048   ;;  %vm1090_vm3 = vcmask 1041409  }
  0x47   : > { %489 = vmatprep.mubr.f32.mxu0 %v1572_v1  ;;  %560 = vmatprep.mubr.f32.mxu1 %v1572_v1  ;;  %v1715_v6 = vld [vmem:[%s1700_s16 + $0x28] sm:$0xff]  ;;  %v211_v7 = vmax.f32 %v1709_v4, %v1712_v5  ;;  %v1720_v8 = vld [vmem:[%s1700_s16 + $0x38] sm:$0xff]  ;;  %v1723_v9 = vld [vmem:[%s1700_s16] sm:$0xff]  ;;  %vm1093_vm4 = vcmask 1042434   ;;  %vm1096_vm5 = vcmask 1043459   ;;  %vm1099_vm6 = vcmask 1044484  }
  0x48   : > { %v413_v2 = vshrl.u32 %v412_v0, 7  ;;  %v415_v3 = vand.u32 127, %v412_v0  ;;  %v1726_v10 = vld [vmem:[%s1700_s16 + $0x10] sm:$0xff]  ;;  %v225_v12 = vmax.f32 %v1715_v6, %v1720_v8  ;;  %v1733_v14 = vld [vmem:[%s1700_s16 + $0x20] sm:$0xff]  ;;  %v1740_v17 = vld [vmem:[%s1700_s16 + $0x48] sm:$0xff]  ;;  %vm1102_vm7 = vcmask 1045509  }
  0x49   : > { %v204_v13 = vmax.f32 %v1723_v9, %v1726_v10  ;;  %v1736_v15 = vld [vmem:[%s1700_s16 + $0x30] sm:$0xff]  ;;  %v212_v18 = vrot.slane %v211_v7, 4  ;;  %v1745_v20 = vld [vmem:[%s1700_s16 + $0x58] sm:$0xff]  ;;  %v1748_v21 = vld [vmem:[%s1700_s16 + $0x68] sm:$0xff]  ;;  %vm1105_vm8 = vcmask 1046534   ;;  %s1249_s17 = sshll.u32 %s1696_s12, 4 }
  0x4a   : > { %vm418_vm0 = vcmp.eq.s32.totalorder %v413_v2, 1  ;;  %v417_v11 = vcvt.s32.f32 %v415_v3  ;;  %vm416_vm1 = vcmp.eq.s32.totalorder %v413_v2, 0  ;;  %v218_v19 = vmax.f32 %v1733_v14, %v1736_v15  ;;  %v1751_v22 = vld [vmem:[%s1700_s16 + $0x78] sm:$0xff]  ;;  %v1758_v27 = vld [vmem:[%s1700_s16 + $0x40] sm:$0xff]  ;;  %v1761_v28 = vld [vmem:[%s1700_s16 + $0x50] sm:$0xff]  ;;  %s160_s24 = scalar_lea.vmem [#allocation5], %s1249_s17 }
  0x4b   : > { %v419_v16 = vsel %vm418_vm0, 1.0, %v1572_v1  ;;  %v226_v23 = vrot.slane %v225_v12, 4  ;;  %v205_v24 = vrot.slane %v204_v13, 4  ;;  %v239_v25 = vmax.f32 %v1740_v17, %v1745_v20  ;;  %v1764_v29 = vld [vmem:[%s1700_s16 + $0x60] sm:$0xff]  ;;  %v1772_v34 = vld [vmem:[%s1700_s16 + $0x70] sm:$0xff]  ;;  %s1129_s25 = scalar_lea.sflag [#allocation4], %s1696_s12 }
  0x4c   : > { %v253_v26 = vmax.f32 %v1748_v21, %v1751_v22  ;;  %v213_v30 = vmax.f32 %v211_v7, %v212_v18  ;;  %v219_v31 = vrot.slane %v218_v19, 4  ;;  %v1767_v32 = vsel %vm416_vm1, %v417_v11, %v419_v16  ;;  %s1259_s27 = sshll.u32 (%p1631_p9), %s1559_s9, 1 }
  0x4d   : > { %v232_v33 = vmax.f32 %v1758_v27, %v1761_v28  ;;  %v227_v35 = vmax.f32 %v225_v12, %v226_v23  ;;  %v206_v36 = vmax.f32 %v204_v13, %v205_v24  ;;  %v240_v37 = vrot.slane %v239_v25, 4  ;;  %s1137_s3 = ssub.s32 (%p1631_p9), 3, %s1259_s27 }
  0x4e   : > { %v254_v38 = vrot.slane %v253_v26, 4  ;;  %v214_v39 = vrot.slane %v213_v30, 2  ;;  %v220_v40 = vmax.f32 %v218_v19, %v219_v31  ;;  %v246_v42 = vmax.f32 %v1764_v29, %v1772_v34  ;;  %p1138_p8 = scmp.lt.s32.totalorder (%p1631_p9), %s1137_s3, 2 }
  0x4f   : > { %v233_v41 = vrot.slane %v232_v33, 4  ;;  %v228_v43 = vrot.slane %v227_v35, 2  ;;  %v207_v44 = vrot.slane %v206_v36, 2  ;;  %v241_v45 = vmax.f32 %v239_v25, %v240_v37  ;;  %v1785_v37 = vld [vmem:[%s1700_s16 + $0x88] sm:$0xff] }
  0x50   : > { %v255_v46 = vmax.f32 %v253_v26, %v254_v38  ;;  %v215_v47 = vmax.f32 %v213_v30, %v214_v39  ;;  %v221_v48 = vrot.slane %v220_v40, 2  ;;  %v247_v50 = vrot.slane %v246_v42, 4 }
  0x51   : > { %v234_v49 = vmax.f32 %v232_v33, %v233_v41  ;;  %v229_v51 = vmax.f32 %v227_v35, %v228_v43  ;;  %v208_v52 = vmax.f32 %v206_v36, %v207_v44  ;;  %v242_v53 = vrot.slane %v241_v45, 2  ;;  %v1795_v44 = vld [vmem:[%s1700_s16 + $0xa8] sm:$0xff] }
  0x52   : > { %v256_v54 = vrot.slane %v255_v46, 2  ;;  %v216_v55 = vrot.slane %v215_v47, 1  ;;  %v222_v56 = vmax.f32 %v220_v40, %v221_v48  ;;  %v248_v58 = vmax.f32 %v246_v42, %v247_v50 }
  0x53   : > { %v235_v57 = vrot.slane %v234_v49, 2  ;;  %v230_v59 = vrot.slane %v229_v51, 1  ;;  %v209_v60 = vrot.slane %v208_v52, 1  ;;  %v243_v61 = vmax.f32 %v241_v45, %v242_v53  ;;  %v1814_v53 = vld [vmem:[%s1700_s16 + $0xb0] sm:$0xff] }
  0x54   : > { %v257_v62 = vmax.f32 %v255_v46, %v256_v54  ;;  %v217_v63 = vmax.f32 %v215_v47, %v216_v55  ;;  %v223_v0 = vrot.slane %v222_v56, 1  ;;  %v249_v3 = vrot.slane %v248_v58, 2  ;;  %v1802_v47 = vld [vmem:[%s1700_s16 + $0x80] sm:$0xff] }
  0x55   : > { %v236_v2 = vmax.f32 %v234_v49, %v235_v57  ;;  %v231_v7 = vmax.f32 %v229_v51, %v230_v59  ;;  %v210_v11 = vmax.f32 %v208_v52, %v209_v60  ;;  %v244_v12 = vrot.slane %v243_v61, 1  ;;  %v1808_v51 = vld [vmem:[%s1700_s16 + $0x90] sm:$0xff]  ;;  %v1811_v52 = vld [vmem:[%s1700_s16 + $0xa0] sm:$0xff]  ;;  %v1820_v57 = vld [vmem:[%s1700_s16 + $0xd8] sm:$0xff] }
  0x56   : > { %v258_v13 = vrot.slane %v257_v62, 1  ;;  %v317_v16 = vsub.f32 %v1709_v4, %v217_v63  ;;  %v319_v18 = vsub.f32 %v1712_v5, %v217_v63  ;;  %v224_v19 = vmax.f32 %v222_v56, %v223_v0  ;;  %v1788_v4 = vld [vmem:[%s1700_s16 + $0x98] sm:$0xff]  ;;  %v1817_v56 = vld [vmem:[%s1700_s16 + $0xc8] sm:$0xff] }
  0x57   : > { %v237_v23 = vrot.slane %v236_v2, 1  ;;  %v321_v24 = vsub.f32 %v1715_v6, %v231_v7  ;;  %v323_v25 = vsub.f32 %v1720_v8, %v231_v7  ;;  %v316_v26 = vsub.f32 %v1723_v9, %v210_v11 }
  0x58   : > { %v318_v30 = vsub.f32 %v1726_v10, %v210_v11  ;;  %v350_v31 = vmul.f32 1.442695, %v317_v16  ;;  %v354_v33 = vmul.f32 1.442695, %v319_v18  ;;  %v320_v35 = vsub.f32 %v1733_v14, %v224_v19 }
  0x59   : > { %v322_v36 = vsub.f32 %v1736_v15, %v224_v19  ;;  %v358_v5 = vmul.f32 1.442695, %v321_v24  ;;  %v362_v38 = vmul.f32 1.442695, %v323_v25  ;;  %v348_v6 = vmul.f32 1.442695, %v316_v26 }
  0x5a   : > { %v245_v39 = vmax.f32 %v243_v61, %v244_v12  ;;  %1361 = vpow2.f32 %v350_v31  ;;  %v352_v8 = vmul.f32 1.442695, %v318_v30  ;;  %v356_v9 = vmul.f32 1.442695, %v320_v35  ;;  %v1833_v35 = vld [vmem:[%s1700_s16 + $0xe8] sm:$0xff] }
  0x5b   : > { %v360_v10 = vmul.f32 1.442695, %v322_v36  ;;  %1363 = vpow2.f32 %v354_v33  ;;  %v259_v40 = vmax.f32 %v257_v62, %v258_v13  ;;  %v238_v41 = vmax.f32 %v236_v2, %v237_v23  ;;  %v1836_v36 = vld [vmem:[%s1700_s16 + $0xf8] sm:$0xff] }
  0x5c   : > { %v325_v14 = vsub.f32 %v1740_v17, %v245_v39  ;;  %v327_v15 = vsub.f32 %v1745_v20, %v245_v39  ;;  %1365 = vpow2.f32 %v358_v5  ;;  %v250_v42 = vmax.f32 %v248_v58, %v249_v3  ;;  %v1799_v20 = vld [vmem:[%s1700_s16 + $0xb8] sm:$0xff] }
  0x5d   : > { %v267_v43 = vmax.f32 %v1785_v37, %v1788_v4  ;;  %1367 = vpow2.f32 %v362_v38  ;;  %v329_v17 = vsub.f32 %v1748_v21, %v259_v40  ;;  %v331_v48 = vsub.f32 %v1751_v22, %v259_v40 }
  0x5e   : > { %v366_v45 = vmul.f32 1.442695, %v325_v14  ;;  %v370_v46 = vmul.f32 1.442695, %v327_v15  ;;  %1369 = vpow2.f32 %v348_v6  ;;  %v324_v49 = vsub.f32 %v1758_v27, %v238_v41 }
  0x5f   : > { %v326_v50 = vsub.f32 %v1761_v28, %v238_v41  ;;  %1371 = vpow2.f32 %v352_v8  ;;  %v374_v54 = vmul.f32 1.442695, %v329_v17  ;;  %v251_v21 = vrot.slane %v250_v42, 1 }
  0x60   : > { %v268_v55 = vrot.slane %v267_v43, 4  ;;  %1373 = vpow2.f32 %v356_v9  ;;  %v378_v22 = vmul.f32 1.442695, %v331_v48  ;;  %v364_v58 = vmul.f32 1.442695, %v324_v49 }
  0x61   : > { %v368_v27 = vmul.f32 1.442695, %v326_v50  ;;  %1375 = vpow2.f32 %v360_v10  ;;  %v252_v28 = vmax.f32 %v250_v42, %v251_v21  ;;  %v281_v60 = vmax.f32 %v1795_v44, %v1799_v20 }
  0x62   : > { %v269_v59 = vmax.f32 %v267_v43, %v268_v55  ;;  %1377 = vpow2.f32 %v366_v45  ;;  %v260_v61 = vmax.f32 %v1802_v47, %v1808_v51  ;;  %v274_v62 = vmax.f32 %v1811_v52, %v1814_v53 }
  0x63   : > { %v295_v63 = vmax.f32 %v1817_v56, %v1820_v57  ;;  %1379 = vpow2.f32 %v370_v46  ;;  %v328_v0 = vsub.f32 %v1764_v29, %v252_v28  ;;  %v330_v2 = vsub.f32 %v1772_v34, %v252_v28 }
  0x64   : > { %v270_v3 = vrot.slane %v269_v59, 2  ;;  %v1362_v7 = vpop.eup %1361  ;;  %1381 = vpow2.f32 %v374_v54  ;;  %v282_v11 = vrot.slane %v281_v60, 4  ;;  %v261_v12 = vrot.slane %v260_v61, 4 }
  0x65   : > { %v275_v13 = vrot.slane %v274_v62, 4  ;;  %v1364_v16 = vpop.eup %1363  ;;  %1383 = vpow2.f32 %v378_v22  ;;  %v372_v18 = vmul.f32 1.442695, %v328_v0  ;;  %v376_v19 = vmul.f32 1.442695, %v330_v2 }
  0x66   : > { %v271_v23 = vmax.f32 %v269_v59, %v270_v3  ;;  %v1366_v24 = vpop.eup %1365  ;;  %v1271_v25 = vpack.c.bf16 %v1364_v16, %v1362_v7  ;;  %1385 = vpow2.f32 %v364_v58  ;;  %v283_v29 = vmax.f32 %v281_v60, %v282_v11  ;;  %v1843_v58 = vld [vmem:[%s1700_s16 + $0xc0] sm:$0xff] }
  0x67   : > { %v262_v26 = vmax.f32 %v260_v61, %v261_v12  ;;  %v1368_v34 = vpop.eup %1367  ;;  %1387 = vpow2.f32 %v368_v27  ;;  %v276_v31 = vmax.f32 %v274_v62, %v275_v13  ;;  %v296_v33 = vrot.slane %v295_v63, 4  ;;  %v1846_v27 = vld [vmem:[%s1700_s16 + $0xd0] sm:$0xff] }
  0x68   : > { %v272_v30 = vrot.slane %v271_v23, 1  ;;  %v1370_v5 = vpop.eup %1369  ;;  %1272 = vmatprep.subr.bf16.mxu0 %v1271_v25  ;;  %v1275_v38 = vpack.c.bf16 %v1368_v34, %v1366_v24  ;;  %1389 = vpow2.f32 %v372_v18  ;;  %v284_v6 = vrot.slane %v283_v29, 2  ;;  %v1859_v24 = vld [vmem:[%s1700_s16 + $0xf0] sm:$0xff] }
  0x69   : > { %v263_v39 = vrot.slane %v262_v26, 2  ;;  %v1372_v8 = vpop.eup %1371  ;;  %1391 = vpow2.f32 %v376_v19  ;;  %v277_v10 = vrot.slane %v276_v31, 2  ;;  %v297_v14 = vmax.f32 %v295_v63, %v296_v33 }
  0x6a   : > { %v273_v9 = vmax.f32 %v271_v23, %v272_v30  ;;  %v1374_v15 = vpop.eup %1373  ;;  %1276 = vmatprep.subr.bf16.mxu1 %v1275_v38  ;;  %v1273_v40 = vpack.c.bf16 %v1372_v8, %v1370_v5  ;;  %v285_v41 = vmax.f32 %v283_v29, %v284_v6  ;;  %v309_v43 = vmax.f32 %v1833_v35, %v1836_v36  ;;  %v1856_v23 = vld [vmem:[%s1700_s16 + $0xe0] sm:$0xff] }
  0x6b   : > { %v264_v42 = vmax.f32 %v262_v26, %v263_v39  ;;  %v1376_v45 = vpop.eup %1375  ;;  %v278_v48 = vmax.f32 %v276_v31, %v277_v10  ;;  %v298_v49 = vrot.slane %v297_v14, 2  ;;  %v288_v12 = vmax.f32 %v1843_v58, %v1846_v27 }
  0x6c   : > { %v333_v46 = vsub.f32 %v1785_v37, %v273_v9  ;;  %v335_v17 = vsub.f32 %v1788_v4, %v273_v9  ;;  %v1378_v50 = vpop.eup %1377  ;;  %1274 = vmatpush1.bf16.msra.mxu0 %v1273_v40  ;;  %v1277_v54 = vpack.c.bf16 %v1376_v45, %v1374_v15  ;;  %v286_v21 = vrot.slane %v285_v41, 1 }
  0x6d   : > { %v265_v55 = vrot.slane %v264_v42, 1  ;;  %v310_v22 = vrot.slane %v309_v43, 4  ;;  %v1380_v28 = vpop.eup %1379  ;;  %v279_v61 = vrot.slane %v278_v48, 1  ;;  %v299_v62 = vmax.f32 %v297_v14, %v298_v49 }
  0x6e   : > { %v382_v59 = vmul.f32 1.442695, %v333_v46  ;;  %v386_v60 = vmul.f32 1.442695, %v335_v17  ;;  %v1382_v37 = vpop.eup %1381  ;;  %1278 = vmatpush1.bf16.msra.mxu1 %v1277_v54  ;;  %v1279_v4 = vpack.c.bf16 %v1380_v28, %v1378_v50  ;;  %v287_v63 = vmax.f32 %v285_v41, %v286_v21 }
  0x6f   : > { %v266_v0 = vmax.f32 %v264_v42, %v265_v55  ;;  %v311_v2 = vmax.f32 %v309_v43, %v310_v22  ;;  %v1384_v3 = vpop.eup %1383  ;;  %1250 = vmatmul.mubr.msk.f32.vlgmr.msra.gmra.mrb[0].mxu0 %vm421_vm2, %v1767_v32  ;;  %v280_v7 = vmax.f32 %v278_v48, %v279_v61  ;;  %v300_v11 = vrot.slane %v299_v62, 1 }
  0x70   : > { %1393 = vpow2.f32 %v382_v59  ;;  %v1386_v13 = vpop.eup %1385  ;;  %1280 = vmatprep.subr.bf16.mxu0 %v1279_v4  ;;  %v1283_v16 = vpack.c.bf16 %v1384_v3, %v1382_v37  ;;  %631 = vmatprep.mubr.f32.mxu0 %v1572_v1  ;;  %v337_v18 = vsub.f32 %v1795_v44, %v287_v63  ;;  %v339_v19 = vsub.f32 %v1799_v20, %v287_v63 }
  0x71   : > { %1395 = vpow2.f32 %v386_v60  ;;  %v1388_v25 = vpop.eup %1387  ;;  %1251 = vmatmul.mubr.msk.f32.vlgmr.msra.gmra.mrb[0].mxu1 %vm421_vm2, %v1767_v32  ;;  %v332_v29 = vsub.f32 %v1802_v47, %v266_v0  ;;  %v334_v26 = vsub.f32 %v1808_v51, %v266_v0  ;;  %v336_v34 = vsub.f32 %v1811_v52, %v280_v7 }
  0x72   : > { %v338_v30 = vsub.f32 %v1814_v53, %v280_v7  ;;  %v1390_v31 = vpop.eup %1389  ;;  %1284 = vmatprep.subr.bf16.mxu1 %v1283_v16  ;;  %v1281_v44 = vpack.c.bf16 %v1388_v25, %v1386_v13  ;;  %702 = vmatprep.mubr.f32.mxu1 %v1572_v1  ;;  %v390_v20 = vmul.f32 1.442695, %v337_v18  ;;  %v394_v33 = vmul.f32 1.442695, %v339_v19 }
  0x73   : > { %v301_v5 = vmax.f32 %v299_v62, %v300_v11  ;;  %v1392_v38 = vpop.eup %1391  ;;  %v380_v6 = vmul.f32 1.442695, %v332_v29  ;;  %v384_v39 = vmul.f32 1.442695, %v334_v26  ;;  %v388_v8 = vmul.f32 1.442695, %v336_v34 }
  0x74   : > { %v302_v47 = vmax.f32 %v1856_v23, %v1859_v24  ;;  %1282 = vmatpush1.bf16.msra.mxu0 %v1281_v44  ;;  %v1285_v51 = vpack.c.bf16 %v1392_v38, %v1390_v31  ;;  %1397 = vpow2.f32 %v390_v20  ;;  %v392_v52 = vmul.f32 1.442695, %v338_v30 }
  0x75   : > { %v341_v53 = vsub.f32 %v1817_v56, %v301_v5  ;;  %1399 = vpow2.f32 %v394_v33  ;;  %v343_v9 = vsub.f32 %v1820_v57, %v301_v5  ;;  %v312_v10 = vrot.slane %v311_v2, 2 }
  0x76   : > { %v289_v14 = vrot.slane %v288_v12, 4  ;;  %1286 = vmatpush1.bf16.msra.mxu1 %v1285_v51  ;;  %1401 = vpow2.f32 %v380_v6  ;;  %v303_v40 = vrot.slane %v302_v47, 4  ;;  %vm1108_vm9 = vcmask 1047559  }
  0x77   : > { %v398_v15 = vmul.f32 1.442695, %v341_v53  ;;  %1252 = vmatmul.mubr.msk.f32.vlgmr.msra.gmra.mrb[2].mxu0 %vm421_vm2, %v1767_v32  ;;  %1403 = vpow2.f32 %v384_v39  ;;  %v402_v41 = vmul.f32 1.442695, %v343_v9  ;;  %v313_v42 = vmax.f32 %v311_v2, %v312_v10 }
  0x78   : > { %v290_v43 = vmax.f32 %v288_v12, %v289_v14  ;;  %1405 = vpow2.f32 %v388_v8  ;;  %773 = vmatprep.mubr.f32.mxu0 %v1572_v1  ;;  %v304_v56 = vmax.f32 %v302_v47, %v303_v40 }
  0x79   : > { %1253 = vmatmul.mubr.msk.f32.vlgmr.msra.gmra.mrb[2].mxu1 %vm421_vm2, %v1767_v32  ;;  %1407 = vpow2.f32 %v392_v52  ;;  %v314_v57 = vrot.slane %v313_v42, 1 }
  0x7a   : > { %v1394_v45 = vpop.eup %1393  ;;  %v291_v46 = vrot.slane %v290_v43, 2  ;;  %844 = vmatprep.mubr.f32.mxu1 %v1572_v1  ;;  %1409 = vpow2.f32 %v398_v15  ;;  %v305_v48 = vrot.slane %v304_v56, 2 }
  0x7b   : > { %v1396_v17 = vpop.eup %1395  ;;  %1411 = vpow2.f32 %v402_v41  ;;  %v315_v50 = vmax.f32 %v313_v42, %v314_v57 }
  0x7c   : > { %v1287_v49 = vpack.c.bf16 %v1396_v17, %v1394_v45  ;;  %v292_v54 = vmax.f32 %v290_v43, %v291_v46  ;;  %v306_v21 = vmax.f32 %v304_v56, %v305_v48 }
  0x7d   : > { %v345_v55 = vsub.f32 %v1833_v35, %v315_v50  ;;  %v347_v22 = vsub.f32 %v1836_v36, %v315_v50 }
  0x7e   : > { %1288 = vmatprep.subr.bf16.mxu0 %v1287_v49  ;;  %v293_v28 = vrot.slane %v292_v54, 1  ;;  %v1398_v59 = vpop.eup %1397  ;;  %v307_v60 = vrot.slane %v306_v21, 1 }
  0x7f   : > { %v1400_v61 = vpop.eup %1399  ;;  %v406_v62 = vmul.f32 1.442695, %v345_v55  ;;  %v410_v37 = vmul.f32 1.442695, %v347_v22 }
  0x80   : > { %v294_v4 = vmax.f32 %v292_v54, %v293_v28  ;;  %v1402_v63 = vpop.eup %1401  ;;  %v1291_v0 = vpack.c.bf16 %v1400_v61, %v1398_v59  ;;  %v308_v2 = vmax.f32 %v306_v21, %v307_v60 }
  0x81   : > { %v1404_v3 = vpop.eup %1403  ;;  %1413 = vpow2.f32 %v406_v62 }
  0x82   : > { %v340_v7 = vsub.f32 %v1843_v58, %v294_v4  ;;  %v342_v11 = vsub.f32 %v1846_v27, %v294_v4  ;;  %v1406_v12 = vpop.eup %1405  ;;  %1292 = vmatprep.subr.bf16.mxu1 %v1291_v0  ;;  %v1289_v35 = vpack.c.bf16 %v1404_v3, %v1402_v63  ;;  %1415 = vpow2.f32 %v410_v37 }
  0x83   : > { %v344_v36 = vsub.f32 %v1856_v23, %v308_v2  ;;  %v346_v13 = vsub.f32 %v1859_v24, %v308_v2  ;;  %v1408_v16 = vpop.eup %1407 }
  0x84   : > { %v396_v18 = vmul.f32 1.442695, %v340_v7  ;;  %v400_v19 = vmul.f32 1.442695, %v342_v11  ;;  %v1410_v25 = vpop.eup %1409  ;;  %1290 = vmatpush1.bf16.msra.mxu0 %v1289_v35  ;;  %v1293_v29 = vpack.c.bf16 %v1408_v16, %v1406_v12 }
  0x85   : > { %v404_v26 = vmul.f32 1.442695, %v344_v36  ;;  %v408_v34 = vmul.f32 1.442695, %v346_v13  ;;  %v1412_v30 = vpop.eup %1411 }
  0x86   : > { %1417 = vpow2.f32 %v396_v18  ;;  %1294 = vmatpush1.bf16.msra.mxu1 %v1293_v29  ;;  %v1295_v58 = vpack.c.bf16 %v1412_v30, %v1410_v25 }
  0x87   : > { %1419 = vpow2.f32 %v400_v19  ;;  %1254 = vmatmul.mubr.msk.f32.vlgmr.msra.gmra.mrb[4].mxu0 %vm421_vm2, %v1767_v32 }
  0x88   : > { %1421 = vpow2.f32 %v404_v26  ;;  %1296 = vmatprep.subr.bf16.mxu0 %v1295_v58  ;;  %915 = vmatprep.mubr.f32.mxu0 %v1572_v1 }
  0x89   : > { %1423 = vpow2.f32 %v408_v34  ;;  %1255 = vmatmul.mubr.msk.f32.vlgmr.msra.gmra.mrb[4].mxu1 %vm421_vm2, %v1767_v32 }
  0x8a   : > { %986 = vmatprep.mubr.f32.mxu1 %v1572_v1 }
  0x8b   : > { %v1414_v27 = vpop.eup %1413 }
  0x8c   : > { %v1416_v23 = vpop.eup %1415 }
  0x8d   : > { %v1299_v24 = vpack.c.bf16 %v1416_v23, %v1414_v27 }
  0x8f   : > { %1300 = vmatprep.subr.bf16.mxu1 %v1299_v24 }
  0x90   : > { %v1418_v31 = vpop.eup %1417 }
  0x91   : > { %v1420_v44 = vpop.eup %1419 }
  0x92   : > { %v1422_v20 = vpop.eup %1421  ;;  %v1297_v33 = vpack.c.bf16 %v1420_v44, %v1418_v31 }
  0x93   : > { %v1424_v5 = vpop.eup %1423 }
  0x94   : > { %1298 = vmatpush1.bf16.msra.mxu0 %v1297_v33  ;;  %v1301_v38 = vpack.c.bf16 %v1424_v5, %v1422_v20 }
  0x96   : > { %1302 = vmatpush1.bf16.msra.mxu1 %v1301_v38 }
  0x97   : > { %1256 = vmatmul.mubr.msk.f32.vlgmr.msra.gmra.mrb[6].mxu0 %vm421_vm2, %v1767_v32 }
  0x99   : > { %1257 = vmatmul.mubr.msk.f32.vlgmr.msra.gmra.mrb[6].mxu1 %vm421_vm2, %v1767_v32 }
 0x142   : > { %v491_v6 = vpop.f32.mrb[0].mxu0 }
 0x143   : > { %v1009_v1 = vrot.slane %v491_v6, 1  ;;  %v493_v39 = vpop.f32.mrb[1].mxu0 }
 0x144   : > { %v562_v8 = vpop.f32.mrb[0].mxu1  ;;  %v1010_v47 = vrot.slane %v493_v39, 1 }
 0x145   : > { %1425 = vrcp.f32 %v1009_v1  ;;  %v1011_v51 = vrot.slane %v562_v8, 1  ;;  %v564_v52 = vpop.f32.mrb[1].mxu1 }
 0x146   : > { %1427 = vrcp.f32 %v1010_v47  ;;  %v1012_v53 = vrot.slane %v564_v52, 1 }
 0x147   : > { %1429 = vrcp.f32 %v1011_v51 }
 0x148   : > { %1431 = vrcp.f32 %v1012_v53 }
 0x14a   : > { %v633_v9 = vpop.f32.mrb[2].mxu0 }
 0x14b   : > { %v1013_v10 = vrot.slane %v633_v9, 1  ;;  %v635_v14 = vpop.f32.mrb[3].mxu0 }
 0x14c   : > { %v704_v15 = vpop.f32.mrb[2].mxu1  ;;  %v1014_v40 = vrot.slane %v635_v14, 1 }
 0x14d   : > { %1433 = vrcp.f32 %v1013_v10  ;;  %v1015_v41 = vrot.slane %v704_v15, 1  ;;  %v706_v32 = vpop.f32.mrb[3].mxu1 }
 0x14e   : > { %1435 = vrcp.f32 %v1014_v40  ;;  %v1016_v42 = vrot.slane %v706_v32, 1 }
 0x14f   : > { %v1426_v43 = vpop.eup %1425  ;;  %1437 = vrcp.f32 %v1015_v41 }
 0x150   : > { %v1428_v56 = vpop.eup %1427  ;;  %1439 = vrcp.f32 %v1016_v42  ;;  %v1042_v48 = vmul.f32 %v1426_v43, %v491_v6 }
 0x151   : > { %v1430_v45 = vpop.eup %1429  ;;  %v1044_v50 = vmul.f32 %v1428_v56, %v493_v39 }
 0x152   : > { %v1432_v57 = vpop.eup %1431  ;;  %v1046_v46 = vmul.f32 %v1430_v45, %v562_v8 }
 0x153   : > { %v1048_v17 = vmul.f32 %v1432_v57, %v564_v52 }
 0x154   : > { %v1089_v49 = vrot.slane %v1046_v46, 7 }
 0x155   : > { %v1110_v54 = vrot.slane %v1048_v17, 7 }
 0x156   : > { %v1091_v21 = vsel %vm1090_vm3, %v1089_v49, %v1042_v48 }
 0x157   : > { %v1434_v55 = vpop.eup %1433  ;;  %v1111_v22 = vsel %vm1090_vm3, %v1110_v54, %v1044_v50 }
 0x158   : > { %v1436_v28 = vpop.eup %1435  ;;  %v1050_v59 = vmul.f32 %v1434_v55, %v633_v9 }
 0x159   : > { %v1438_v60 = vpop.eup %1437  ;;  %v1052_v61 = vmul.f32 %v1436_v28, %v635_v14 }
 0x15a   : > { %v1440_v62 = vpop.eup %1439  ;;  %v1092_v37 = vrot.slane %v1050_v59, 6  ;;  %v1054_v4 = vmul.f32 %v1438_v60, %v704_v15  ;;  %v775_v63 = vpop.f32.mrb[4].mxu0 }
 0x15b   : > { %v1112_v0 = vrot.slane %v1052_v61, 6  ;;  %v1056_v2 = vmul.f32 %v1440_v62, %v706_v32  ;;  %v1017_v3 = vrot.slane %v775_v63, 1  ;;  %v777_v7 = vpop.f32.mrb[5].mxu0 }
 0x15c   : > { %v1094_v11 = vsel %vm1093_vm4, %v1092_v37, %v1091_v21  ;;  %v1095_v12 = vrot.slane %v1054_v4, 5  ;;  %v846_v35 = vpop.f32.mrb[4].mxu1  ;;  %v1018_v36 = vrot.slane %v777_v7, 1 }
 0x15d   : > { %v1113_v13 = vsel %vm1093_vm4, %v1112_v0, %v1111_v22  ;;  %v1114_v16 = vrot.slane %v1056_v2, 5  ;;  %1441 = vrcp.f32 %v1017_v3  ;;  %v1019_v18 = vrot.slane %v846_v35, 1  ;;  %v848_v19 = vpop.f32.mrb[5].mxu1 }
 0x15e   : > { %v1097_v25 = vsel %vm1096_vm5, %v1095_v12, %v1094_v11  ;;  %1443 = vrcp.f32 %v1018_v36  ;;  %v1020_v29 = vrot.slane %v848_v19, 1 }
 0x15f   : > { %v1115_v26 = vsel %vm1096_vm5, %v1114_v16, %v1113_v13  ;;  %1445 = vrcp.f32 %v1019_v18 }
 0x160   : > { %1447 = vrcp.f32 %v1020_v29 }
 0x167   : > { %v1442_v34 = vpop.eup %1441 }
 0x168   : > { %v1444_v30 = vpop.eup %1443  ;;  %v1058_v58 = vmul.f32 %v1442_v34, %v775_v63 }
 0x169   : > { %v1446_v27 = vpop.eup %1445  ;;  %v1060_v23 = vmul.f32 %v1444_v30, %v777_v7 }
 0x16a   : > { %v917_v24 = vpop.f32.mrb[6].mxu0  ;;  %v1448_v31 = vpop.eup %1447  ;;  %v1098_v44 = vrot.slane %v1058_v58, 4  ;;  %v1062_v20 = vmul.f32 %v1446_v27, %v846_v35 }
 0x16b   : > { %v1021_v33 = vrot.slane %v917_v24, 1  ;;  %v919_v5 = vpop.f32.mrb[7].mxu0  ;;  %v1116_v38 = vrot.slane %v1060_v23, 4  ;;  %v1064_v6 = vmul.f32 %v1448_v31, %v848_v19 }
 0x16c   : > { %v988_v1 = vpop.f32.mrb[6].mxu1  ;;  %v1022_v39 = vrot.slane %v919_v5, 1  ;;  %v1100_v8 = vsel %vm1099_vm6, %v1098_v44, %v1097_v25  ;;  %v1101_v47 = vrot.slane %v1062_v20, 3 }
 0x16d   : > { %1449 = vrcp.f32 %v1021_v33  ;;  %v1023_v51 = vrot.slane %v988_v1, 1  ;;  %v990_v52 = vpop.f32.mrb[7].mxu1  ;;  %v1117_v53 = vsel %vm1099_vm6, %v1116_v38, %v1115_v26  ;;  %v1118_v9 = vrot.slane %v1064_v6, 3 }
 0x16e   : > { %1451 = vrcp.f32 %v1022_v39  ;;  %v1024_v10 = vrot.slane %v990_v52, 1  ;;  %v1103_v14 = vsel %vm1102_vm7, %v1101_v47, %v1100_v8 }
 0x16f   : > { %1453 = vrcp.f32 %v1023_v51  ;;  %v1119_v15 = vsel %vm1102_vm7, %v1118_v9, %v1117_v53 }
 0x170   : > { %1455 = vrcp.f32 %v1024_v10 }
 0x177   : > { %v1450_v40 = vpop.eup %1449 }
 0x178   : > { %v1452_v41 = vpop.eup %1451  ;;  %v1066_v32 = vmul.f32 %v1450_v40, %v917_v24 }
 0x179   : > { %v1454_v42 = vpop.eup %1453  ;;  %v1068_v43 = vmul.f32 %v1452_v41, %v919_v5 }
 0x17a   : > { %v1456_v56 = vpop.eup %1455  ;;  %v1104_v45 = vrot.slane %v1066_v32, 2  ;;  %v1070_v57 = vmul.f32 %v1454_v42, %v988_v1  ;;  %1135 = sbr.rel (!%p1631_p9) target bundleno = 412 (0x19c), region = 32 }
 0x17b   : > { %v1120_v46 = vrot.slane %v1068_v43, 2  ;;  %v1072_v17 = vmul.f32 %v1456_v56, %v990_v52 }
 0x17c   : > { %v1106_v48 = vsel %vm1105_vm8, %v1104_v45, %v1103_v14  ;;  %v1107_v49 = vrot.slane %v1070_v57, 1 }
 0x17d   : > { %v1121_v50 = vsel %vm1105_vm8, %v1120_v46, %v1119_v15  ;;  %v1122_v54 = vrot.slane %v1072_v17, 1 }
 0x17e   : > { %v1109_v21 = vsel %vm1108_vm9, %v1107_v49, %v1106_v48 }
 0x17f   : > { %1126 = vst [vmem:[%s160_s24] sm:$0xff] %v1109_v21  ;;  %v1123_v55 = vsel %vm1108_vm9, %v1122_v54, %v1121_v50 }
 0x180   : > { %1127 = vst [vmem:[%s160_s24 + $0x8] sm:$0xff] %v1123_v55 }
 0x181   : > { %s1980_s3 = smov (!%p1138_p8, %s1137_s3), 2 }
 0x182   : > { %s1905_s4 = sshll.u32 %s1980_s3, 7 }
 0x183   : > { %s1142_s5 = ssub.s32 256, %s1905_s4 }
 0x184   : > { %1143 = vsyncadd %s1129_s25, %s1142_s5  ;;  %p1261_p12 = scmp.ne.s32.totalorder %s1905_s4, 0  ;;  %s1270_s21 = sshll.u32 %s1559_s9, 8 }
 0x185   : > { %s1915_s23 = scalar_lea.hbm %s1963_s1, %s1270_s21  ;;  %s1151_s26 = sshll.u32 %s160_s24, 4  ;;  %s1152_s26 = int_to_ptr.vmem [resolvable:$true] %s1151_s26 }
 0x186   : > { %s1485_s28 = scalar_lea.vmem %s1152_s26, %s1905_s4  ;;  %s1573_s29 = smov [#allocation5]  }
 0x187   : > { %p1486_p9 = scmp.ne.s32.totalorder %s1152_s26, %s1485_s28  ;;  %s1489_s30 = sshll.u32 %s1573_s29, 4  ;;  %s1490_s30 = int_to_ptr.vmem [resolvable:$false] %s1489_s30 }
 0x188   : > { %s1491_s2 = scalar_lea.vmem %s1490_s30, 512  ;;  %p1492_p13 = scmp.lt.s32.totalorder %s1152_s26, %s1490_s30 }
 0x189   : > { %p1487_p0 = pnand %p1486_p9, %p1261_p12  ;;  %p1493_p1 = scmp.lt.s32.totalorder %s1491_s2, %s1485_s28 }
 0x18b   : > { %p1488_p10 = pneg %p1487_p0  ;;  %p1494_p2 = por %p1493_p1, %p1492_p13 }
 0x18d   : > { %p1495_p4 = pnand %p1494_p2, %p1488_p10 }
 0x18f   : > { %1498 = shalt.err (!%p1495_p4)
}
 0x190   : > { %s1499_s9 = scalar_lea.hbm %s1915_s23, %s1905_s4  ;;  %s1503_s16 = scalar_lea.hbm %s1963_s1, 384 }
 0x191   : > { %p1500_p5 = scmp.ne.s32.totalorder %s1915_s23, %s1499_s9  ;;  %p1504_p7 = scmp.lt.u32.totalorder %s1915_s23, %s1963_s1 }
 0x192   : > { %p1505_p11 = scmp.lt.u32.totalorder %s1503_s16, %s1499_s9  ;;  %p1507_p9 = scmp.lt.u32.totalorder %s1499_s9, %s1915_s23 }
 0x193   : > { %p1501_p6 = pnand %p1500_p5, %p1261_p12 }
 0x194   : > { %p1506_p8 = por %p1505_p11, %p1504_p7 }
 0x195   : > { %p1502_p3 = pneg %p1501_p6 }
 0x196   : > { %p1508_p0 = por %p1507_p9, %p1506_p8 }
 0x198   : > { %p1509_p10 = pnand %p1508_p0, %p1502_p3 }
 0x19a   : > { %1512 = shalt.err (!%p1509_p10)
}
 0x19b   : > { %1154 = dma.vmem_to_hbm [thread:$0]  (%p1261_p12), %s1152_s26, %s1905_s4, %s1915_s23, %s1129_s25  }
 0x19c PF: > { %s1163_s27 = sand.u32 1, %s1547_s6   ;;  %p1968_p13 = scmp.ne.s32.totalorder %s1967_s20, 0 }
 0x19d   : > { %p1969_p1 = scmp.ge.s32.totalorder %s1567_s11, 2  ;;  %s1164_s3 = scalar_lea.sflag [#allocation4], %s1163_s27 }
 0x19f   : > { %p1306_p2 = pnand %p1969_p1, %p1968_p13 }
 0x1a1   : > { %1542 = dma.done.wait (!%p1306_p2), %s1164_s3, 256  }
 0x1a2   : > { %1544 = vsyncadd (!%p1306_p2), %s1164_s3, 4294967040  ;;  %s17_s11 = sadd.s32 1, %s1567_s11   ;;  %s1970_s6 = smov %s1551_s7 }
 0x1a3   : > { %p14_p4 = scmp.ge.s32.totalorder %s17_s11, 4   ;;  %s1971_s7 = smov %s1555_s8 }
 0x1a4   : > { %s1972_s8 = smov %s1636_s19  ;;  %s1973_s9 = smov %s1563_s10 }
 0x1a5   : > { %s1974_s10 = smov %s1976_s14  ;;  %16 = sbr.rel (!%p14_p4) target bundleno = 6 (0x6), region = 69 }
 0x1ac   :  { %1169 = vsyncpa [#allocation3], 1 }
 0x1ad   :  { %1171 = vsyncpa [#allocation3 + $0x1], 1 }
 0x1ae   :  { %1172 = vsyncpa [#allocation4], 1 }
 0x1af   :  { %1174 = vsyncpa [#allocation4 + $0x1], 1 }

</bundles_post_ra>
